<compile_context>
chip_gen: v5e
topology: v5e:2x2
jax: 0.10.0
libtpu: 0.0.40
codegen_flags: <defaults>
</compile_context>

<pallas_src>
import functools

import jax
import jax.numpy as jnp
from jax.experimental import pallas as pl
from jax.experimental.pallas import tpu as pltpu


# ---------------------------------------------------------------------------
# Generation-keyed VMEM budgets
# ---------------------------------------------------------------------------
@functools.lru_cache(maxsize=None)
def _vmem_capacity_bytes():
    """Physical VMEM per TensorCore; conservative (v7x) default if unknown."""
    try:
        info = pltpu.get_tpu_info()
        cap = getattr(info, "vmem_capacity_bytes", None)
        if cap:
            return int(cap)
    except Exception:
        pass
    return 64 * 1024 * 1024  # v7x per-TensorCore VMEM (smallest generation)


@functools.lru_cache(maxsize=None)
def _vmem_limit_bytes():
    # Scoped VMEM we ask Mosaic for: half of physical, capped at 64 MiB.
    # (v5e/v6e: 64 MiB; v7x / unknown: 32 MiB.)
    return min(_vmem_capacity_bytes() // 2, 64 * 1024 * 1024)


def _fused_slab_f32_limit_bytes():
    # Fused path working set ~= 2x in (dbuf) + 2x out (dbuf) + f32 temp of the
    # slab; keep the f32 slab under 1/8 of the scoped limit for headroom.
    return _vmem_limit_bytes() // 8


def _block_budget_bytes():
    # Fallback streaming path: ~1-4 MiB per input block (bigger on chips with
    # more VMEM), which is enough to reach ~85%+ of HBM roofline.
    return max(1 << 20, _vmem_limit_bytes() // 16)


def _divisor_tile(n, unit, max_tile):
    """Largest multiple of `unit` that divides `n` and is <= max_tile.

    Falls back to `n` (full extent) when `n` is not a multiple of `unit`
    (the (8,128) block rule then requires the full dimension).
    """
    if n % unit != 0:
        return n
    best = unit
    m = unit
    top = min(n, max_tile)
    while m <= top:
        if n % m == 0:
            best = m
        m += unit
    return best


def _excite(mean_c1, w1t, w2):
    """Tiny SE FCs, layout-natural (C on sublanes throughout), VPU + XLU only.

    mean_c1: (C, 1) f32     w1t: (C, Cr) f32 (= W1^T)     w2: (C, Cr) f32
    returns scale (C, 1) f32 in [0, 1].
    """
    # FC1 + ReLU:  h[j] = relu(sum_c W1[j, c] * mean[c])   -> (1, Cr)
    h = jnp.maximum(jnp.sum(w1t * mean_c1, axis=0, keepdims=True), 0.0)
    # FC2 + hsigmoid:  s[c] = hsig(sum_j W2[c, j] * h[j])  -> (C, 1)
    s = jnp.sum(w2 * h, axis=1, keepdims=True)
    return jnp.clip(s + 3.0, 0.0, 6.0) * (1.0 / 6.0)


# ---------------------------------------------------------------------------
# Fused kernel: pool + FCs + hsigmoid + rescale, one batch element per step
# ---------------------------------------------------------------------------
def _fused_se_kernel(x_ref, w1t_ref, w2_ref, o_ref, *, inv_hw):
    # x_ref/o_ref: (1, C, HW); w1t_ref: (C, Cr); w2_ref: (C, Cr)
    xf = x_ref[...].astype(jnp.float32)                      # (1, C, HW)
    # Squeeze: global average pool (cross-lane reduce, C stays on sublanes).
    mean = jnp.sum(xf, axis=2, keepdims=True)[0] * inv_hw    # (C, 1)
    # Excite: two tiny FCs (negligible FLOPs, off the MXU / no relayout).
    s = _excite(mean,
                w1t_ref[...].astype(jnp.float32),
                w2_ref[...].astype(jnp.float32))             # (C, 1)
    # Rescale: lane-broadcast of the per-channel scale, f32 product, cast back
    # to the native I/O dtype (HBM traffic stays in the input dtype).
    o_ref[...] = (xf * s[None, :, :]).astype(o_ref.dtype)


# ---------------------------------------------------------------------------
# Fallback pass 1: tiled pool with FCs folded into the last-step finalize
# ---------------------------------------------------------------------------
def _pool_fc_kernel(x_ref, w1t_ref, w2_ref, scale_ref, acc_ref, *, inv_hw):
    # x_ref: (1, C, t_hw); scale_ref: (1, C, 1) f32 (resident across hw axis)
    hi = pl.program_id(1)

    @pl.when(hi == 0)
    def _init():
        acc_ref[...] = jnp.zeros_like(acc_ref)

    acc_ref[...] += jnp.sum(x_ref[...].astype(jnp.float32), axis=2,
                            keepdims=True)

    @pl.when(hi == pl.num_programs(1) - 1)
    def _finalize():
        mean = acc_ref[...][0] * inv_hw                      # (C, 1)
        s = _excite(mean,
                    w1t_ref[...].astype(jnp.float32),
                    w2_ref[...].astype(jnp.float32))         # (C, 1)
        scale_ref[...] = s[None, :, :]


# ---------------------------------------------------------------------------
# Fallback pass 2: streaming per-channel rescale
# ---------------------------------------------------------------------------
def _rescale_kernel(x_ref, s_ref, o_ref):
    # x_ref: (1, t_c, t_hw) native dtype; s_ref: (1, t_c, 1) f32
    o_ref[...] = (x_ref[...].astype(jnp.float32) * s_ref[...]).astype(o_ref.dtype)


def se_module(x_nchw, w1, w2, *, donate_x=False, force_two_pass=False):
    """x_nchw: (B, C, H, W); w1: (C//r, C); w2: (C, C//r) (PyTorch Linear layout).

    donate_x: alias x's HBM buffer to the output (only when x is dead after SE).
    """
    B, C, H, W = x_nchw.shape
    Cr = w1.shape[0]
    HW = H * W
    x_flat = x_nchw.reshape(B, C, HW)
    w1t = jnp.swapaxes(w1, 0, 1)                              # (C, Cr) = W1^T
    itemsize = jnp.dtype(x_nchw.dtype).itemsize
    w_bytes = int((w1.size + w2.size) * jnp.dtype(w1.dtype).itemsize)

    slab_f32_bytes = C * HW * 4
    use_fused = (slab_f32_bytes <= _fused_slab_f32_limit_bytes()
                 and not force_two_pass)

    if use_fused:
        cost = pl.CostEstimate(
            flops=2 * B * C * HW + 4 * B * C * Cr,
            transcendentals=0,
            bytes_accessed=2 * B * C * HW * itemsize + w_bytes)
        out_flat = pl.pallas_call(
            functools.partial(_fused_se_kernel, inv_hw=1.0 / HW),
            out_shape=jax.ShapeDtypeStruct((B, C, HW), x_nchw.dtype),
            grid_spec=pltpu.PrefetchScalarGridSpec(
                num_scalar_prefetch=0,
                grid=(B,),
                in_specs=[
                    pl.BlockSpec((1, C, HW), lambda b: (b, 0, 0)),
                    pl.BlockSpec((C, Cr), lambda b: (0, 0)),
                    pl.BlockSpec((C, Cr), lambda b: (0, 0)),
                ],
                out_specs=pl.BlockSpec((1, C, HW), lambda b: (b, 0, 0)),
            ),
            compiler_params=pltpu.CompilerParams(
                dimension_semantics=("parallel",),
                vmem_limit_bytes=_vmem_limit_bytes()),
            cost_estimate=cost,
            input_output_aliases=({0: 0} if donate_x else {}),
        )(x_flat, w1t, w2)
        return out_flat.reshape(B, C, H, W)

    # ---- Two-pass fallback for per-batch slabs that do not fit VMEM ----
    # TODO(synk): a huge per-batch slab whose HW is not a multiple of 128 would
    # need a C-tiled three-pass structure; never hit by MobileNetV3 SE stages.
    budget = _block_budget_bytes()

    # Pass 1: pool (+ folded FCs) over HW tiles, full C per block.
    t_hw1 = _divisor_tile(HW, 128, max(128, budget // max(1, C * itemsize)))
    n_hw1 = HW // t_hw1
    scale = pl.pallas_call(
        functools.partial(_pool_fc_kernel, inv_hw=1.0 / HW),
        out_shape=jax.ShapeDtypeStruct((B, C, 1), jnp.float32),
        grid_spec=pltpu.PrefetchScalarGridSpec(
            num_scalar_prefetch=0,
            grid=(B, n_hw1),
            in_specs=[
                pl.BlockSpec((1, C, t_hw1), lambda b, hi: (b, 0, hi)),
                pl.BlockSpec((C, Cr), lambda b, hi: (0, 0)),
                pl.BlockSpec((C, Cr), lambda b, hi: (0, 0)),
            ],
            out_specs=pl.BlockSpec((1, C, 1), lambda b, hi: (b, 0, 0)),
            scratch_shapes=[pltpu.VMEM((1, C, 1), jnp.float32)],
        ),
        compiler_params=pltpu.CompilerParams(
            dimension_semantics=("parallel", "arbitrary"),
            vmem_limit_bytes=_vmem_limit_bytes()),
        cost_estimate=pl.CostEstimate(
            flops=B * C * HW + 4 * B * C * Cr, transcendentals=0,
            bytes_accessed=B * C * HW * itemsize + w_bytes + B * C * 4),
    )(x_flat, w1t, w2)

    # Pass 2: streaming rescale, large lane-dense blocks, fully parallel grid.
    t_hw2 = _divisor_tile(HW, 128, 2048)
    t_c = _divisor_tile(C, 8, max(8, budget // max(1, t_hw2 * itemsize)))
    n_c, n_hw2 = C // t_c, HW // t_hw2
    out_flat = pl.pallas_call(
        _rescale_kernel,
        out_shape=jax.ShapeDtypeStruct((B, C, HW), x_nchw.dtype),
        grid_spec=pltpu.PrefetchScalarGridSpec(
            num_scalar_prefetch=0,
            grid=(B, n_c, n_hw2),
            in_specs=[
                pl.BlockSpec((1, t_c, t_hw2), lambda b, ci, hi: (b, ci, hi)),
                pl.BlockSpec((1, t_c, 1), lambda b, ci, hi: (b, ci, 0)),
            ],
            out_specs=pl.BlockSpec((1, t_c, t_hw2), lambda b, ci, hi: (b, ci, hi)),
        ),
        compiler_params=pltpu.CompilerParams(
            dimension_semantics=("parallel", "parallel", "parallel"),
            vmem_limit_bytes=_vmem_limit_bytes()),
        cost_estimate=pl.CostEstimate(
            flops=B * C * HW, transcendentals=0,
            bytes_accessed=2 * B * C * HW * itemsize + B * C * 4),
        input_output_aliases=({0: 0} if donate_x else {}),
    )(x_flat, scale)

    return out_flat.reshape(B, C, H, W)


def se_module_ref(x, w1, w2):
    """Pure-JAX reference mirroring the PyTorch forward."""
    y = jnp.mean(x, axis=(2, 3))                          # (B, C)
    y = jnp.maximum(y @ w1.T, 0.0)                        # (B, Cr)
    y = jnp.clip(y @ w2.T + 3.0, 0.0, 6.0) / 6.0          # (B, C)
    return x * y[:, :, None, None]


if __name__ == "__main__":
    # Small shapes consistent with the module: batch=2, channels=32,
    # spatial=16x16, reduction=4 -> hidden = 8.
    B, C, H, W = 2, 32, 16, 16
    reduction = 4
    Cr = C // reduction

    key = jax.random.PRNGKey(0)
    kx, k1, k2 = jax.random.split(key, 3)
    x = jax.random.normal(kx, (B, C, H, W), dtype=jnp.float32)
    # Deterministic synthetic weights (PyTorch Linear layout: out x in).
    w1 = jax.random.normal(k1, (Cr, C), dtype=jnp.float32) * 0.1
    w2 = jax.random.normal(k2, (C, Cr), dtype=jnp.float32) * 0.1

    ref = se_module_ref(x, w1, w2)

    # Primary fused path (one pallas_call, 2x-of-x HBM traffic).
    out = jax.block_until_ready(se_module(x, w1, w2))
    assert out.shape == (B, C, H, W)
    assert jnp.allclose(out, ref, atol=1e-5, rtol=1e-5), "fused mismatch vs reference"

    # Also exercise the large-slab two-pass fallback on the same inputs.
    out_fb = jax.block_until_ready(se_module(x, w1, w2, force_two_pass=True))
    assert jnp.allclose(out_fb, ref, atol=1e-5, rtol=1e-5), "fallback mismatch vs reference"

    print("KERNEL_OK")
</pallas_src>

<mosaic_0001>
module attributes {stable_mosaic.version = 11 : i64} {
  func.func @_fused_se_kernel(%arg0: i32, %arg1: memref<1x32x256xf32, #tpu.memory_space<vmem>>, %arg2: memref<32x8xf32, #tpu.memory_space<vmem>>, %arg3: memref<32x8xf32, #tpu.memory_space<vmem>>, %arg4: memref<1x32x256xf32, #tpu.memory_space<vmem>>) attributes {dimension_semantics = [#tpu.dimension_semantics<parallel>], iteration_bounds = array<i64: 2>, scalar_prefetch = 0 : i64, scratch_operands = 0 : i64, tpu.core_type = #tpu.core_type<tc>, window_params = [{transform_indices = @transform_0, window_bounds = array<i64: 1, 32, 256>}, {pipeline_mode = #tpu.pipeline_mode<synchronous>, transform_indices = @transform_1, window_bounds = array<i64: 32, 8>}, {pipeline_mode = #tpu.pipeline_mode<synchronous>, transform_indices = @transform_2, window_bounds = array<i64: 32, 8>}, {transform_indices = @transform_3, window_bounds = array<i64: 1, 32, 256>}]} {
    %c0 = arith.constant 0 : index
    %c0_0 = arith.constant 0 : index
    %c0_1 = arith.constant 0 : index
    %0 = vector.load %arg1[%c0, %c0_0, %c0_1] : memref<1x32x256xf32, #tpu.memory_space<vmem>>, vector<1x32x256xf32>
    %cst = arith.constant dense<0.000000e+00> : vector<1x32xf32>
    %1 = vector.multi_reduction <add>, %0, %cst [2] : vector<1x32x256xf32> to vector<1x32xf32>
    %2 = vector.shape_cast %1 : vector<1x32xf32> to vector<1x32x1xf32>
    %3 = vector.shape_cast %2 : vector<1x32x1xf32> to vector<32x1xf32>
    %cst_2 = arith.constant 3.906250e-03 : f32
    %4 = vector.broadcast %cst_2 : f32 to vector<32x1xf32>
    %5 = arith.mulf %3, %4 : vector<32x1xf32>
    %c0_3 = arith.constant 0 : index
    %c0_4 = arith.constant 0 : index
    %6 = vector.load %arg2[%c0_3, %c0_4] : memref<32x8xf32, #tpu.memory_space<vmem>>, vector<32x8xf32>
    %c0_5 = arith.constant 0 : index
    %c0_6 = arith.constant 0 : index
    %7 = vector.load %arg3[%c0_5, %c0_6] : memref<32x8xf32, #tpu.memory_space<vmem>>, vector<32x8xf32>
    %8 = vector.broadcast %5 : vector<32x1xf32> to vector<32x8xf32>
    %9 = arith.mulf %6, %8 : vector<32x8xf32>
    %cst_7 = arith.constant dense<0.000000e+00> : vector<8xf32>
    %10 = vector.multi_reduction <add>, %9, %cst_7 [0] : vector<32x8xf32> to vector<8xf32>
    %11 = vector.shape_cast %10 : vector<8xf32> to vector<1x8xf32>
    %cst_8 = arith.constant 0.000000e+00 : f32
    %12 = vector.broadcast %cst_8 : f32 to vector<1x8xf32>
    %13 = arith.maximumf %11, %12 : vector<1x8xf32>
    %14 = vector.broadcast %13 : vector<1x8xf32> to vector<32x8xf32>
    %15 = arith.mulf %7, %14 : vector<32x8xf32>
    %cst_9 = arith.constant dense<0.000000e+00> : vector<32xf32>
    %16 = vector.multi_reduction <add>, %15, %cst_9 [1] : vector<32x8xf32> to vector<32xf32>
    %17 = vector.shape_cast %16 : vector<32xf32> to vector<32x1xf32>
    %cst_10 = arith.constant 3.000000e+00 : f32
    %18 = vector.broadcast %cst_10 : f32 to vector<32x1xf32>
    %19 = arith.addf %17, %18 : vector<32x1xf32>
    %cst_11 = arith.constant 0.000000e+00 : f32
    %cst_12 = arith.constant 6.000000e+00 : f32
    %20 = vector.broadcast %cst_11 : f32 to vector<32x1xf32>
    %21 = arith.maximumf %20, %19 : vector<32x1xf32>
    %22 = vector.broadcast %cst_12 : f32 to vector<32x1xf32>
    %23 = arith.minimumf %22, %21 : vector<32x1xf32>
    %cst_13 = arith.constant 0.166666672 : f32
    %24 = vector.broadcast %cst_13 : f32 to vector<32x1xf32>
    %25 = arith.mulf %23, %24 : vector<32x1xf32>
    %26 = vector.shape_cast %25 : vector<32x1xf32> to vector<1x32x1xf32>
    %27 = vector.broadcast %26 : vector<1x32x1xf32> to vector<1x32x256xf32>
    %28 = arith.mulf %0, %27 : vector<1x32x256xf32>
    %c0_14 = arith.constant 0 : index
    %c0_15 = arith.constant 0 : index
    %c0_16 = arith.constant 0 : index
    %29 = vector.load %arg4[%c0_14, %c0_15, %c0_16] : memref<1x32x256xf32, #tpu.memory_space<vmem>>, vector<1x32x256xf32>
    tpu.vector_store %arg4[%c0_14, %c0_15, %c0_16], %28 {strides = array<i32>} : memref<1x32x256xf32, #tpu.memory_space<vmem>>, vector<1x32x256xf32>,
    return
  }
  func.func @transform_0(%arg0: i32) -> (i32, i32, i32) {
    %c0_i32 = arith.constant 0 : i32
    %c0_i32_0 = arith.constant 0 : i32
    %c0_i32_1 = arith.constant 0 : i32
    return %arg0, %c0_i32, %c0_i32_0 : i32, i32, i32
  }
  func.func @transform_1(%arg0: i32) -> (i32, i32) {
    %c0_i32 = arith.constant 0 : i32
    %c0_i32_0 = arith.constant 0 : i32
    %c0_i32_1 = arith.constant 0 : i32
    return %c0_i32, %c0_i32_0 : i32, i32
  }
  func.func @transform_2(%arg0: i32) -> (i32, i32) {
    %c0_i32 = arith.constant 0 : i32
    %c0_i32_0 = arith.constant 0 : i32
    %c0_i32_1 = arith.constant 0 : i32
    return %c0_i32, %c0_i32_0 : i32, i32
  }
  func.func @transform_3(%arg0: i32) -> (i32, i32, i32) {
    %c0_i32 = arith.constant 0 : i32
    %c0_i32_0 = arith.constant 0 : i32
    %c0_i32_1 = arith.constant 0 : i32
    return %arg0, %c0_i32, %c0_i32_0 : i32, i32, i32
  }
}

</mosaic_0001>

<bundles_post_ra>
// kernel: tpu_custom_call.1
= control target key start
LH: loop header
LB: loop body
LE: loop exit
PB: predicated region body
PF: predicated region fallthrough
CT: control target
= control target key end

     0   :  { %8 = vsyncpa [#allocation3], 0  ;;  %s762_s0 = inlined_call_operand.hbm [shape: f32[2,32,256], index: 0, kind: input, shape index: {}]   ;;  %s763_s1 = inlined_call_operand.vmem [shape: f32[32,8], index: 1, kind: input, shape index: {}]   ;;  %s764_s2 = inlined_call_operand.vmem [shape: f32[32,8], index: 2, kind: input, shape index: {}]   ;;  %s765_s3 = inlined_call_operand.hbm [shape: f32[2,32,256], index: 3, kind: output, shape index: {}]  }
   0x1   :  { %10 = vsyncpa [#allocation3 + $0x1], 0 }
   0x2   :  { %11 = vsyncpa [#allocation4], 0 }
   0x3   :  { %13 = vsyncpa [#allocation4 + $0x1], 0  ;;  %s567_s12 = smov 0   ;;  %s569_s13 = smov 0  }
   0x4   :  { %s571_s14 = smov 0   ;;  %s573_s15 = smov 0  }
   0x5 LB: > { %s588_s16 = sadd.s32 4294967295, %s541_s15   ;;  %s379_s17 = sadd.s32 4294967294, %s541_s15   ;;  %s541_s15 = sphi %s573_s15, %s775_s15   ;;  %s537_s14 = sphi %s571_s14, %s774_s14   ;;  %s533_s13 = sphi %s569_s13, %s773_s13   ;;  %s529_s12 = sphi %s567_s12, %s772_s12  }
   0x6   : > { %s592_s18 = sadd.s32 1, %s541_s15   ;;  %s26_s19 = sadd.s32 1, %s537_s14 }
   0x7   : > { %s23_s20 = ssub.s32 %s541_s15, %s592_s18  ;;  %p33_p0 = scmp.ne.s32.totalorder %s537_s14, %s533_s13 }
   0x8   : > { %p24_p1 = scmp.eq.s32.totalorder %s23_s20, 0  ;;  %p34_p2 = scmp.eq.s32.totalorder %s541_s15, 0 }
   0x9   : > { %p39_p3 = scmp.ne.s32.totalorder %s533_s13, %s529_s12  ;;  %p40_p4 = scmp.eq.s32.totalorder %s588_s16, 0 }
   0xa   : > { %s604_s21 = scalar_select %p24_p1, %s537_s14, %s26_s19  }
   0xb   : > { %p606_p5 = por %p34_p2, %p33_p0  ;;  %p610_p6 = por %p40_p4, %p39_p3 }
   0xc   : > { %p105_p7 = scmp.eq.s32.totalorder %s588_s16, 1  ;;  %p111_p8 = scmp.eq.s32.totalorder %s379_s17, 1 }
   0xd   : > { %p407_p10 = scmp.lt.s32.totalorder %s541_s15, 2  ;;  %s137_s26 = sand.u32 1, %s537_s14  }
   0xe   : > { %p617_p11 = por %p105_p7, %p33_p0  ;;  %p621_p12 = por %p111_p8, %p39_p3 }
   0xf   : > { %s393_s27 = sshll.u32 %s541_s15, 6  ;;  %s382_s28 = sshll.u32 %s137_s26, 6 }
  0x10   : > { %s146_s4 = scalar_lea.hbm %s762_s0, %s393_s27  ;;  %s141_s6 = scalar_lea.vmem [#allocation2], %s382_s28 }
  0x11   : > { %s147_s5 = sshll.u32 %s146_s4, 4  ;;  %s149_s7 = sshll.u32 %s141_s6, 4  ;;  %s148_s5 = int_to_ptr.hbm [resolvable:$true] %s147_s5  ;;  %s150_s7 = int_to_ptr.vmem [resolvable:$true] %s149_s7 }
  0x12   : > { %p632_p13 = pnand %p407_p10, %p606_p5  ;;  %p385_p0 = scmp.ge.s32.totalorder %s541_s15, 1 }
  0x13   : > { %p157_p1 = scmp.lt.s32.totalorder %s541_s15, 3  ;;  %s138_s9 = scalar_lea.sflag [#allocation3], %s137_s26 }
  0x14   : > { %s445_s10 = sshra.s32 %s148_s5, 4  ;;  %p449_p3 = pneg %p632_p13  ;;  %s446_s10 = int_to_ptr.hbm [resolvable:$true] %s445_s10 }
  0x15   : > { %s447_s11 = scalar_lea.hbm %s446_s10, 64  ;;  %s452_s20 = scalar_lea.hbm %s762_s0, 128 }
  0x16   : > { %p448_p2 = scmp.ne.s32.totalorder %s446_s10, %s447_s11  ;;  %p453_p5 = scmp.lt.s32.totalorder %s446_s10, %s762_s0 }
  0x17   : > { %p454_p8 = scmp.lt.s32.totalorder %s452_s20, %s447_s11 }
  0x18   : > { %p450_p4 = pnand %p449_p3, %p448_p2 }
  0x19   : > { %p455_p10 = por %p454_p8, %p453_p5 }
  0x1a   : > { %p451_p7 = pneg %p450_p4 }
  0x1c   : > { %p456_p9 = pnand %p455_p10, %p451_p7 }
  0x1e   : > { %459 = shalt.err (!%p456_p9)
}
  0x1f   : > { %s543_s26 = smov 256   ;;  %s544_s28 = smov 16  }
  0x20   : > { %402 = dma.hbm_to_vmem [thread:$0]  (!%p632_p13), %s148_s5, 1024, %s150_s7, %s138_s9, %s543_s26, %s543_s26, %s544_s28  }
  0x21   : > { %p158_p2 = pnand %p385_p0, %p157_p1 }
  0x22   : > { %s653_s29 = sand.u32 (!%p158_p2), 1, %s533_s13  }
  0x23   : > { %161 = sbr.rel (%p158_p2) target bundleno = 336 (0x150), region = 32  ;;  %s386_s30 = sshll.u32 (!%p158_p2), %s653_s29, 6 }
  0x24   : > { %s164_s4 = scalar_lea.sflag (!%p158_p2), [#allocation3], %s653_s29  ;;  %s167_s6 = scalar_lea.vmem (!%p158_p2), [#allocation2], %s386_s30 }
  0x28   : > { %520 = dma.done.wait (%p610_p6), %s164_s4, 1024  }
  0x29   : > { %522 = vsyncadd (%p610_p6), %s164_s4, 4294966272  ;;  %v663_v0 = vld [vmem:[%s167_s6] sm:$0xff]  ;;  %v665_v1 = vld [vmem:[%s167_s6 + $0x8] sm:$0xff]  ;;  %vm227_vm0 = vcmask 64512   ;;  %s394_s23 = sshll.u32 %s588_s16, 6  ;;  %s190_s5 = scalar_lea.vmem [#allocation5], %s386_s30 }
  0x2a   : > { %v667_v2 = vld [vmem:[%s167_s6 + $0x20] sm:$0xff]  ;;  %v199_v3 = vadd.f32 %v665_v1, %v663_v0  ;;  %v671_v4 = vld [vmem:[%s167_s6 + $0x28] sm:$0xff]  ;;  %v675_v6 = vld [vmem:[%s167_s6 + $0x10] sm:$0xff]  ;;  %s302_s9 = scalar_lea.hbm %s765_s3, %s394_s23  ;;  %s303_s10 = sshll.u32 %s190_s5, 4  ;;  %s304_s10 = int_to_ptr.vmem [resolvable:$true] %s303_s10 }
  0x2b   : > { %v205_v5 = vadd.f32 %v671_v4, %v667_v2  ;;  %v677_v7 = vld [vmem:[%s167_s6 + $0x18] sm:$0xff]  ;;  %v679_v8 = vld [vmem:[%s167_s6 + $0x30] sm:$0xff]  ;;  %v215_v15 = vld [vmem:[%s763_s1] sm:$0xff]  ;;  %s305_s16 = sshll.u32 %s302_s9, 4  ;;  %s291_s30 = scalar_lea.sflag [#allocation4], %s653_s29  ;;  %s306_s16 = int_to_ptr.hbm [resolvable:$true] %s305_s16 }
  0x2c   : > { %200 = vadd.xlane.f32.xlu0 %v199_v3  ;;  %v681_v9 = vld [vmem:[%s167_s6 + $0x38] sm:$0xff]  ;;  %v202_v10 = vadd.f32 %v677_v7, %v675_v6  ;;  %v217_v17 = vld [vmem:[%s763_s1 + $0x10] sm:$0xff]  ;;  %v216_v18 = vld [vmem:[%s763_s1 + $0x8] sm:$0xff]  ;;  %s489_s11 = sshra.s32 %s306_s16, 4  ;;  %s495_s22 = scalar_lea.hbm %s765_s3, 128  ;;  %s490_s11 = int_to_ptr.hbm [resolvable:$true] %s489_s11 }
  0x2d   : > { %206 = vadd.xlane.f32.xlu1 %v205_v5  ;;  %v208_v11 = vadd.f32 %v681_v9, %v679_v8  ;;  %v218_v22 = vld [vmem:[%s763_s1 + $0x18] sm:$0xff]  ;;  %v221_v42 = vld [vmem:[%s764_s2 + $0x10] sm:$0xff]  ;;  %v219_v43 = vld [vmem:[%s764_s2] sm:$0xff]  ;;  %s491_s17 = scalar_lea.hbm %s490_s11, 64  ;;  %p496_p0 = scmp.lt.s32.totalorder %s490_s11, %s765_s3 }
  0x2e   : > { %v222_v41 = vld [vmem:[%s764_s2 + $0x18] sm:$0xff]  ;;  %v220_v51 = vld [vmem:[%s764_s2 + $0x8] sm:$0xff]  ;;  %p492_p6 = scmp.ne.s32.totalorder %s490_s11, %s491_s17  ;;  %p497_p1 = scmp.lt.s32.totalorder %s495_s22, %s491_s17 }
  0x30   : > { %p493_p9 = pnand %p492_p6, %p617_p11  ;;  %p498_p3 = por %p497_p1, %p496_p0 }
  0x32   : > { %p494_p13 = pneg %p493_p9 }
  0x34   : > { %203 = vadd.xlane.f32.xlu0 %v202_v10  ;;  %p499_p4 = pnand %p498_p3, %p494_p13 }
  0x35   : > { %209 = vadd.xlane.f32.xlu1 %v208_v11 }
  0x9f   : > { %v201_v12 = vpop.xlane.xlu0 %200 }
  0xa0   : > { %v207_v13 = vpop.xlane.xlu1 %206  ;;  %v211_v14 = vmul.f32 0.00390625, %v201_v12 }
  0xa1   : > { %v213_v16 = vmul.f32 0.00390625, %v207_v13 }
  0xa2   : > { %v223_v20 = vmul.f32 %v215_v15, %v211_v14 }
  0xa3   : > { %v225_v25 = vmul.f32 %v217_v17, %v213_v16 }
  0xa4   : > { %v228_v28 = vsel %vm227_vm0, %v223_v20, 0.0 }
  0xa5   : > { %v231_v31 = vsel %vm227_vm0, %v225_v25, 0.0 }
  0xa7   : > { %v204_v19 = vpop.xlane.xlu0 %203 }
  0xa8   : > { %v212_v21 = vmul.f32 0.00390625, %v204_v19  ;;  %v210_v23 = vpop.xlane.xlu1 %209 }
  0xa9   : > { %v214_v24 = vmul.f32 0.00390625, %v210_v23 }
  0xaa   : > { %v224_v26 = vmul.f32 %v216_v18, %v212_v21 }
  0xab   : > { %v226_v27 = vmul.f32 %v218_v22, %v214_v24 }
  0xac   : > { %v229_v29 = vsel %vm227_vm0, %v224_v26, 0.0 }
  0xad   : > { %v230_v30 = vadd.f32 %v229_v29, %v228_v28  ;;  %v233_v32 = vsel %vm227_vm0, %v226_v27, 0.0 }
  0xaf   : > { %v232_v33 = vadd.f32 %v231_v31, %v230_v30 }
  0xb1   : > { %v234_v34 = vadd.f32 %v233_v32, %v232_v33 }
  0xb3   : > { %v235_v35 = vrot.slane %v234_v34, 4 }
  0xb5   : > { %v236_v36 = vadd.f32 %v235_v35, %v234_v34 }
  0xb7   : > { %v237_v37 = vrot.slane %v236_v36, 2 }
  0xb9   : > { %v238_v38 = vadd.f32 %v237_v37, %v236_v36 }
  0xbb   : > { %v239_v39 = vrot.slane %v238_v38, 1 }
  0xbd   : > { %v240_v40 = vadd.f32 %v239_v39, %v238_v38 }
  0xbf   : > { %v241_v44 = vmax.f32 %v240_v40, 0.0 }
  0xc1   : > { %v245_v45 = vmul.f32 %v241_v44, %v222_v41  ;;  %v244_v46 = vmul.f32 %v241_v44, %v221_v42  ;;  %v242_v47 = vmul.f32 %v241_v44, %v219_v43  ;;  %v243_v52 = vmul.f32 %v241_v44, %v220_v51 }
  0xc3   : > { %v255_v48 = vsel %vm227_vm0, %v245_v45, 0.0  ;;  %v252_v49 = vsel %vm227_vm0, %v244_v46, 0.0  ;;  %v246_v50 = vsel %vm227_vm0, %v242_v47, 0.0  ;;  %v249_v53 = vsel %vm227_vm0, %v243_v52, 0.0 }
  0xc4   : > { %256 = vadd.xlane.f32.xlu1 %v255_v48  ;;  %253 = vadd.xlane.f32.xlu0 %v252_v49 }
  0xc5   : > { %247 = vadd.xlane.f32.xlu2 %v246_v50 }
  0xcd   : > { %250 = vadd.xlane.f32.xlu2 %v249_v53 }
 0x137   : > { %v257_v54 = vpop.xlane.xlu1 %256  ;;  %v254_v55 = vpop.xlane.xlu0 %253 }
 0x138   : > { %v261_v56 = vadd.f32 3.0, %v257_v54  ;;  %v260_v57 = vadd.f32 3.0, %v254_v55  ;;  %v248_v58 = vpop.xlane.xlu2 %247 }
 0x139   : > { %v258_v59 = vadd.f32 3.0, %v248_v58 }
 0x13a   : > { %v265_v60 = vmax.f32 %v261_v56, 0.0  ;;  %v264_v61 = vmax.f32 %v260_v57, 0.0 }
 0x13b   : > { %v262_v62 = vmax.f32 %v258_v59, 0.0 }
 0x13c   : > { %v269_v63 = vmin.f32 %v265_v60, 6.0  ;;  %v268_v3 = vmin.f32 %v264_v61, 6.0 }
 0x13d   : > { %v266_v5 = vmin.f32 %v262_v62, 6.0 }
 0x13e   : > { %v273_v10 = vmul.f32 0.16666667, %v269_v63  ;;  %v272_v11 = vmul.f32 0.16666667, %v268_v3 }
 0x13f   : > { %v270_v12 = vmul.f32 0.16666667, %v266_v5 }
 0x140   : > { %v280_v13 = vmul.f32 %v273_v10, %v679_v8  ;;  %v281_v14 = vmul.f32 %v273_v10, %v681_v9  ;;  %v278_v15 = vmul.f32 %v272_v11, %v667_v2  ;;  %v251_v16 = vpop.xlane.xlu2 %250  ;;  %v279_v17 = vmul.f32 %v272_v11, %v671_v4 }
 0x141   : > { %v259_v18 = vadd.f32 3.0, %v251_v16  ;;  %v274_v19 = vmul.f32 %v270_v12, %v663_v0  ;;  %v275_v20 = vmul.f32 %v270_v12, %v665_v1 }
 0x142   : > { %288 = vst [vmem:[%s190_s5 + $0x30] sm:$0xff] %v280_v13 }
 0x143   : > { %289 = vst [vmem:[%s190_s5 + $0x38] sm:$0xff] %v281_v14  ;;  %v263_v21 = vmax.f32 %v259_v18, 0.0 }
 0x144   : > { %286 = vst [vmem:[%s190_s5 + $0x20] sm:$0xff] %v278_v15 }
 0x145   : > { %287 = vst [vmem:[%s190_s5 + $0x28] sm:$0xff] %v279_v17  ;;  %v267_v2 = vmin.f32 %v263_v21, 6.0 }
 0x146   : > { %282 = vst [vmem:[%s190_s5] sm:$0xff] %v274_v19 }
 0x147   : > { %283 = vst [vmem:[%s190_s5 + $0x8] sm:$0xff] %v275_v20  ;;  %v271_v4 = vmul.f32 0.16666667, %v267_v2 }
 0x149   : > { %v276_v0 = vmul.f32 %v271_v4, %v675_v6  ;;  %v277_v8 = vmul.f32 %v271_v4, %v677_v7 }
 0x14b   : > { %284 = vst [vmem:[%s190_s5 + $0x10] sm:$0xff] %v276_v0 }
 0x14c   : > { %285 = vst [vmem:[%s190_s5 + $0x18] sm:$0xff] %v277_v8 }
 0x14d   : > { %502 = shalt.err (!%p499_p4)
}
 0x14e   : > { %s545_s29 = smov 256   ;;  %s546_s28 = smov 16  }
 0x14f   : > { %397 = dma.vmem_to_hbm [thread:$0]  (%p617_p11), %s304_s10, 1024, %s306_s16, %s291_s30, %s545_s29, %s545_s29, %s546_s28  }
 0x150 PF: > { %s320_s4 = sand.u32 1, %s529_s12   ;;  %p771_p7 = scmp.ge.s32.totalorder %s541_s15, 2 }
 0x151   : > { %s321_s6 = scalar_lea.sflag [#allocation4], %s320_s4 }
 0x152   : > { %p404_p5 = pnand %p771_p7, %p621_p12 }
 0x154   : > { %p405_p8 = pneg %p404_p5 }
 0x156   : > { %524 = dma.done.wait (%p405_p8), %s321_s6, 1024  }
 0x157   : > { %526 = vsyncadd (%p405_p8), %s321_s6, 4294966272  ;;  %p16_p10 = scmp.ge.s32.totalorder %s592_s18, 4   ;;  %s772_s12 = smov %s533_s13 }
 0x158   : > { %s773_s13 = smov %s537_s14  ;;  %s774_s14 = smov %s604_s21 }
 0x159   : > { %s775_s15 = smov %s592_s18  ;;  %18 = sbr.rel (!%p16_p10) target bundleno = 5 (0x5), region = 77 }
 0x15e   :  { %327 = vsyncpa [#allocation3], 1 }
 0x15f   :  { %329 = vsyncpa [#allocation3 + $0x1], 1 }
 0x160   :  { %330 = vsyncpa [#allocation4], 1 }
 0x161   :  { %332 = vsyncpa [#allocation4 + $0x1], 1 }

</bundles_post_ra>
